<compile_context>
chip_gen: v5e
topology: v5e:2x2
jax: 0.10.0
libtpu: 0.0.40
codegen_flags: <defaults>
</compile_context>

<pallas_src>
import functools

import jax
import jax.numpy as jnp
from jax import lax
from jax.experimental import pallas as pl
from jax.experimental.pallas import tpu as pltpu


def _round_up(x, m):
    return ((x + m - 1) // m) * m


def self_attention_kernel(x_ref, w_ref, b_ref, gamma_ref, o_ref, q_scr,
                          *, C, C8p, C_sum, TQ, compute_dtype):
    N = x_ref.shape[-1]
    n_tiles = N // TQ

    x = x_ref[0]                                       # (C, N) f32, current batch element
    w = w_ref[...]                                     # (Cq, C) bf16 (packed Wq|Wk|Wv|ones)
    bias = b_ref[...]                                  # (Cq, 1) f32
    gamma = gamma_ref[0]                               # scalar from SMEM

    # Fused q/k/v projection (1x1 convs == channel matmul); lane axis stays N.
    qkv = jnp.dot(w, x.astype(compute_dtype),
                  preferred_element_type=jnp.float32) + bias          # (Cq, N) f32

    # q gets a dynamic lane slice per query tile -> stage it in a VMEM scratch
    # so the per-tile slice is a plain (128-aligned) ref load.
    q_scr[...] = qkv[:C8p].astype(compute_dtype)                      # (C8p, N)
    k = qkv[C8p:2 * C8p].astype(compute_dtype)                        # (C8p, N)
    # V block augmented with an all-ones row at sublane-aligned index C_sum
    # (zero weights, bias 1.0) -> the PV matmul also emits the softmax denominator.
    v_aug = qkv[2 * C8p:].astype(compute_dtype)                       # (Cv, N)

    def q_tile(qi, carry):
        off = pl.multiple_of(qi * TQ, TQ)
        q_blk = q_scr[:, pl.ds(off, TQ)]                              # (C8p, TQ)

        # energy[i, j] = sum_c q[c, i] * k[c, j]  (contract sublanes, no explicit k^T).
        energy = lax.dot_general(q_blk, k, (((0,), (0,)), ((), ())),
                                 preferred_element_type=jnp.float32)  # (TQ, N)

        # Numerically stable, *unnormalized* softmax numerator (f32 exp; the per-row
        # exp(-m) factor cancels between numerator and denominator).
        m = jnp.max(energy, axis=-1, keepdims=True)
        e = jnp.exp(energy - m).astype(compute_dtype)                 # (TQ, N)

        # out_aug[c, i] = sum_j v_aug[c, j] * e[i, j]; row C_sum = sum_j e[i, j].
        # NT form with the large (TQ, N) operand as RHS -> no hidden XLU transpose.
        out_aug = lax.dot_general(v_aug, e, (((1,), (1,)), ((), ())),
                                  preferred_element_type=jnp.float32)  # (Cv, TQ)

        recip = pl.reciprocal(out_aug[C_sum:C_sum + 1], approx=True)   # (1, TQ) lane vec
        out_blk = out_aug[:C] * recip                                  # (C, TQ)

        x_blk = x_ref[0, :, pl.ds(off, TQ)]                            # residual slice
        o_ref[0, :, pl.ds(off, TQ)] = (gamma * out_blk + x_blk).astype(o_ref.dtype)
        return carry

    lax.fori_loop(0, n_tiles, q_tile, 0)


def self_attention(x_nchw, wq, bq, wk, bk, wv, bv, gamma,
                   *, compute_dtype=jnp.bfloat16):
    """x_nchw: (B, C, W, H) f32.  Conv weights in native (out, in) layout:
       wq/wk: (C//8, C), wv: (C, C); biases 1-D; gamma: (1,)."""
    B, C, W, H = x_nchw.shape
    N = W * H
    C8 = wq.shape[0]

    # Pad q/k row blocks to the compute-dtype sublane tile (16 for bf16, 8 for f32)
    # so the in-kernel bf16 slices are full tiles (no sublane repack).
    sub = 8 * (4 // jnp.dtype(compute_dtype).itemsize)
    C8p = _round_up(C8, sub)
    C_sum = _round_up(C, 8)              # sublane-aligned position of the ones row
    Cv = _round_up(C_sum + 1, 8)         # padded V|ones block height
    Cq = 2 * C8p + Cv
    v_off = 2 * C8p

    # Pack Wq|Wk|Wv (and biases) once in the wrapper, plus one zero-weight/bias-1
    # "ones" row that makes the PV matmul emit the softmax denominator for free.
    w_packed = jnp.zeros((Cq, C), jnp.float32)
    w_packed = (w_packed.at[:C8].set(wq)
                        .at[C8p:C8p + C8].set(wk)
                        .at[v_off:v_off + C].set(wv)).astype(compute_dtype)
    b_packed = jnp.zeros((Cq, 1), jnp.float32)
    b_packed = (b_packed.at[:C8, 0].set(bq)
                        .at[C8p:C8p + C8, 0].set(bk)
                        .at[v_off:v_off + C, 0].set(bv)
                        .at[v_off + C_sum, 0].set(1.0))   # ones row (pad rows stay zero)

    # NCHW -> (B, C, N) is a pure reshape (no transpose).
    x = x_nchw.reshape(B, C, N)

    TQ = 128 if N % 128 == 0 else N      # query-tile width on the lane axis

    kernel = functools.partial(self_attention_kernel, C=C, C8p=C8p, C_sum=C_sum,
                               TQ=TQ, compute_dtype=compute_dtype)

    cost = pl.CostEstimate(
        flops=int(2 * B * (Cq * C * N + C8p * N * N + Cv * N * N)),
        transcendentals=int(B * N * N),
        bytes_accessed=int(2 * B * C * N * 4 + Cq * C * 2 + Cq * 4 + 4))

    out = pl.pallas_call(
        kernel,
        out_shape=jax.ShapeDtypeStruct((B, C, N), x.dtype),
        grid=(B,),
        in_specs=[
            pl.BlockSpec((1, C, N), lambda b: (b, 0, 0)),          # x, one batch per step
            pl.BlockSpec((Cq, C), lambda b: (0, 0)),               # packed weights
            pl.BlockSpec((Cq, 1), lambda b: (0, 0)),               # packed biases
            pl.BlockSpec(memory_space=pltpu.MemorySpace.SMEM),     # gamma scalar
        ],
        out_specs=pl.BlockSpec((1, C, N), lambda b: (b, 0, 0)),
        scratch_shapes=[pltpu.VMEM((C8p, N), compute_dtype)],       # staged q projection
        compiler_params=pltpu.CompilerParams(
            dimension_semantics=("parallel",)),
        cost_estimate=cost,
    )(x, w_packed, b_packed, gamma)

    # (B, C, N) -> NCHW is again a pure reshape.
    return out.reshape(B, C, W, H)


def reference(x_nchw, wq, bq, wk, bk, wv, bv, gamma):
    """Pure-JAX (f32) replica of the PyTorch forward pass, for verification."""
    B, C, W, H = x_nchw.shape
    N = W * H
    x = x_nchw.reshape(B, C, N)                                 # (B, C, N)
    q = jnp.einsum("oc,bcn->bon", wq, x) + bq[None, :, None]    # (B, C8, N)
    k = jnp.einsum("oc,bcn->bon", wk, x) + bk[None, :, None]    # (B, C8, N)
    v = jnp.einsum("oc,bcn->bon", wv, x) + bv[None, :, None]    # (B, C, N)
    energy = jnp.einsum("bci,bcj->bij", q, k)                   # (B, N, N)
    attn = jax.nn.softmax(energy, axis=-1)
    out = jnp.einsum("bcj,bij->bci", v, attn)                   # (B, C, N)
    y = gamma[0] * out + x
    return y.reshape(B, C, W, H)


if __name__ == "__main__":
    # Small shapes consistent with the module: in_channels=32 (so C//8 = 4), 16x16 map.
    B, C, W, H = 2, 32, 16, 16
    C8 = C // 8

    key = jax.random.PRNGKey(0)
    kx, kq, kbq, kk, kbk, kv, kbv = jax.random.split(key, 7)

    x = jax.random.normal(kx, (B, C, W, H), dtype=jnp.float32)

    # Conv2d 1x1 weights in their native (out, in) layout.
    wq = jax.random.normal(kq, (C8, C), dtype=jnp.float32) * 0.1
    bq = jax.random.normal(kbq, (C8,), dtype=jnp.float32) * 0.1
    wk = jax.random.normal(kk, (C8, C), dtype=jnp.float32) * 0.1
    bk = jax.random.normal(kbk, (C8,), dtype=jnp.float32) * 0.1
    wv = jax.random.normal(kv, (C, C), dtype=jnp.float32) * 0.1
    bv = jax.random.normal(kbv, (C,), dtype=jnp.float32) * 0.1
    # Module __init__ sets gamma = 0; use a nonzero value so the attention path
    # is actually exercised by the numerical check.
    gamma = jnp.array([0.5], dtype=jnp.float32)

    y = self_attention(x, wq, bq, wk, bk, wv, bv, gamma)
    y = jax.block_until_ready(y)

    y_ref = reference(x, wq, bq, wk, bk, wv, bv, gamma)
    assert y.shape == (B, C, W, H)
    # bf16 MXU operands + approx reciprocal -> validate with a looser tolerance.
    assert jnp.allclose(y, y_ref, rtol=5e-2, atol=5e-2), "mismatch vs reference"

    print("KERNEL_OK")
</pallas_src>

<mosaic_0001>
module attributes {stable_mosaic.version = 11 : i64} {
  func.func @self_attention_kernel(%arg0: i32, %arg1: memref<1x32x256xf32, #tpu.memory_space<vmem>>, %arg2: memref<72x32xbf16, #tpu.memory_space<vmem>>, %arg3: memref<72x1xf32, #tpu.memory_space<vmem>>, %arg4: memref<1xf32, #tpu.memory_space<smem>>, %arg5: memref<1x32x256xf32, #tpu.memory_space<vmem>>, %arg6: memref<16x256xbf16, #tpu.memory_space<vmem>>) attributes {dimension_semantics = [#tpu.dimension_semantics<parallel>], iteration_bounds = array<i64: 2>, scalar_prefetch = 0 : i64, scratch_operands = 1 : i64, tpu.core_type = #tpu.core_type<tc>, window_params = [{transform_indices = @transform_0, window_bounds = array<i64: 1, 32, 256>}, {pipeline_mode = #tpu.pipeline_mode<synchronous>, transform_indices = @transform_1, window_bounds = array<i64: 72, 32>}, {pipeline_mode = #tpu.pipeline_mode<synchronous>, transform_indices = @transform_2, window_bounds = array<i64: 72, 1>}, {transform_indices = @transform_3, window_bounds = array<i64: 1>}, {transform_indices = @transform_4, window_bounds = array<i64: 1, 32, 256>}]} {
    %c0 = arith.constant 0 : index
    %c0_0 = arith.constant 0 : index
    %c0_1 = arith.constant 0 : index
    %0 = vector.load %arg1[%c0, %c0_0, %c0_1] : memref<1x32x256xf32, #tpu.memory_space<vmem>>, vector<1x32x256xf32>
    %1 = vector.shape_cast %0 : vector<1x32x256xf32> to vector<32x256xf32>
    %c0_2 = arith.constant 0 : index
    %c0_3 = arith.constant 0 : index
    %2 = vector.load %arg2[%c0_2, %c0_3] : memref<72x32xbf16, #tpu.memory_space<vmem>>, vector<72x32xbf16>
    %c0_4 = arith.constant 0 : index
    %c0_5 = arith.constant 0 : index
    %3 = vector.load %arg3[%c0_4, %c0_5] : memref<72x1xf32, #tpu.memory_space<vmem>>, vector<72x1xf32>
    %c0_6 = arith.constant 0 : index
    %4 = memref.load %arg4[%c0_6] : memref<1xf32, #tpu.memory_space<smem>>
    %5 = arith.truncf %1 : vector<32x256xf32> to vector<32x256xbf16>
    %cst = arith.constant dense<0.000000e+00> : vector<72x256xf32>
    %6 = tpu.matmul %2, %5, %cst {dimension_numbers = #tpu.dot_dimension_numbers<[1], [0], [0], [1], [0, 0, 1, 1], [], []>} : vector<72x32xbf16>, vector<32x256xbf16>, vector<72x256xf32> -> vector<72x256xf32>
    %7 = vector.broadcast %3 : vector<72x1xf32> to vector<72x256xf32>
    %8 = arith.addf %6, %7 : vector<72x256xf32>
    %9 = vector.extract_strided_slice %8 {offsets = [0, 0], sizes = [16, 256], strides = [1, 1]} : vector<72x256xf32> to vector<16x256xf32>
    %10 = arith.truncf %9 : vector<16x256xf32> to vector<16x256xbf16>
    %c0_7 = arith.constant 0 : index
    %c0_8 = arith.constant 0 : index
    %11 = vector.load %arg6[%c0_7, %c0_8] : memref<16x256xbf16, #tpu.memory_space<vmem>>, vector<16x256xbf16>
    tpu.vector_store %arg6[%c0_7, %c0_8], %10 {strides = array<i32>} : memref<16x256xbf16, #tpu.memory_space<vmem>>, vector<16x256xbf16>,
    %12 = vector.extract_strided_slice %8 {offsets = [16, 0], sizes = [16, 256], strides = [1, 1]} : vector<72x256xf32> to vector<16x256xf32>
    %13 = arith.truncf %12 : vector<16x256xf32> to vector<16x256xbf16>
    %14 = vector.extract_strided_slice %8 {offsets = [32, 0], sizes = [40, 256], strides = [1, 1]} : vector<72x256xf32> to vector<40x256xf32>
    %15 = arith.truncf %14 : vector<40x256xf32> to vector<40x256xbf16>
    %c0_i32 = arith.constant 0 : i32
    %c2_i32 = arith.constant 2 : i32
    %16 = arith.addi %c0_i32, %c2_i32 : i32
    %c1_i32 = arith.constant 1 : i32
    scf.for %arg7 = %c0_i32 to %16 step %c1_i32  : i32 {
      %c128_i32 = arith.constant 128 : i32
      %17 = arith.muli %arg7, %c128_i32 : i32
      %18 = tpu.assume_multiple %17, 128 : i32
      %c0_10 = arith.constant 0 : index
      %19 = arith.index_cast %18 : i32 to index
      %20 = vector.load %arg6[%c0_10, %19] : memref<16x256xbf16, #tpu.memory_space<vmem>>, vector<16x128xbf16>
      %cst_11 = arith.constant dense<0.000000e+00> : vector<128x256xf32>
      %21 = tpu.matmul %20, %13, %cst_11 {dimension_numbers = #tpu.dot_dimension_numbers<[0], [0], [1], [1], [0, 1, 1, 1], [], []>} : vector<16x128xbf16>, vector<16x256xbf16>, vector<128x256xf32> -> vector<128x256xf32>
      %cst_12 = arith.constant dense<0xFF800000> : vector<128xf32>
      %22 = vector.multi_reduction <maximumf>, %21, %cst_12 [1] : vector<128x256xf32> to vector<128xf32>
      %23 = vector.shape_cast %22 : vector<128xf32> to vector<128x1xf32>
      %24 = vector.broadcast %23 : vector<128x1xf32> to vector<128x256xf32>
      %25 = arith.subf %21, %24 : vector<128x256xf32>
      %26 = math.exp %25 : vector<128x256xf32>
      %27 = arith.truncf %26 : vector<128x256xf32> to vector<128x256xbf16>
      %cst_13 = arith.constant dense<0.000000e+00> : vector<40x128xf32>
      %28 = tpu.matmul %15, %27, %cst_13 {dimension_numbers = #tpu.dot_dimension_numbers<[1], [1], [0], [0], [0, 0, 1, 0], [], []>} : vector<40x256xbf16>, vector<128x256xbf16>, vector<40x128xf32> -> vector<40x128xf32>
      %29 = vector.extract_strided_slice %28 {offsets = [32, 0], sizes = [1, 128], strides = [1, 1]} : vector<40x128xf32> to vector<1x128xf32>
      %30 = tpu.reciprocal %29 {approx = true} : vector<1x128xf32> -> vector<1x128xf32>
      %31 = vector.extract_strided_slice %28 {offsets = [0, 0], sizes = [32, 128], strides = [1, 1]} : vector<40x128xf32> to vector<32x128xf32>
      %32 = vector.broadcast %30 : vector<1x128xf32> to vector<32x128xf32>
      %33 = arith.mulf %31, %32 : vector<32x128xf32>
      %c0_14 = arith.constant 0 : index
      %c0_15 = arith.constant 0 : index
      %34 = arith.index_cast %18 : i32 to index
      %35 = vector.load %arg1[%c0_14, %c0_15, %34] : memref<1x32x256xf32, #tpu.memory_space<vmem>>, vector<1x32x128xf32>
      %36 = vector.shape_cast %35 : vector<1x32x128xf32> to vector<32x128xf32>
      %37 = vector.broadcast %4 : f32 to vector<32x128xf32>
      %38 = arith.mulf %37, %33 : vector<32x128xf32>
      %39 = arith.addf %38, %36 : vector<32x128xf32>
      %c0_16 = arith.constant 0 : index
      %c0_17 = arith.constant 0 : index
      %40 = arith.index_cast %18 : i32 to index
      %41 = vector.load %arg5[%c0_16, %c0_17, %40] : memref<1x32x256xf32, #tpu.memory_space<vmem>>, vector<1x32x128xf32>
      %42 = vector.shape_cast %41 : vector<1x32x128xf32> to vector<32x128xf32>
      %43 = vector.shape_cast %39 : vector<32x128xf32> to vector<1x32x128xf32>
      tpu.vector_store %arg5[%c0_16, %c0_17, %40], %43 {strides = array<i32>} : memref<1x32x256xf32, #tpu.memory_space<vmem>>, vector<1x32x128xf32>,
    }
    %c2_i32_9 = arith.constant 2 : i32
    return
  }
  func.func @transform_0(%arg0: i32) -> (i32, i32, i32) {
    %c0_i32 = arith.constant 0 : i32
    %c0_i32_0 = arith.constant 0 : i32
    %c0_i32_1 = arith.constant 0 : i32
    return %arg0, %c0_i32, %c0_i32_0 : i32, i32, i32
  }
  func.func @transform_1(%arg0: i32) -> (i32, i32) {
    %c0_i32 = arith.constant 0 : i32
    %c0_i32_0 = arith.constant 0 : i32
    %c0_i32_1 = arith.constant 0 : i32
    return %c0_i32, %c0_i32_0 : i32, i32
  }
  func.func @transform_2(%arg0: i32) -> (i32, i32) {
    %c0_i32 = arith.constant 0 : i32
    %c0_i32_0 = arith.constant 0 : i32
    %c0_i32_1 = arith.constant 0 : i32
    return %c0_i32, %c0_i32_0 : i32, i32
  }
  func.func @transform_3(%arg0: i32) -> i32 {
    %c0_i32 = arith.constant 0 : i32
    %c0_i32_0 = arith.constant 0 : i32
    return %c0_i32 : i32
  }
  func.func @transform_4(%arg0: i32) -> (i32, i32, i32) {
    %c0_i32 = arith.constant 0 : i32
    %c0_i32_0 = arith.constant 0 : i32
    %c0_i32_1 = arith.constant 0 : i32
    return %arg0, %c0_i32, %c0_i32_0 : i32, i32, i32
  }
}

</mosaic_0001>

<bundles_post_ra>
// kernel: tpu_custom_call.1
= control target key start
LH: loop header
LB: loop body
LE: loop exit
PB: predicated region body
PF: predicated region fallthrough
CT: control target
= control target key end

     0   :  { %s1649_s0 = inlined_call_operand.hbm [shape: f32[2,32,256], index: 0, kind: input, shape index: {}]   ;;  %s1650_s1 = inlined_call_operand.vmem [shape: bf16[72,32], index: 1, kind: input, shape index: {}]   ;;  %s1651_s2 = inlined_call_operand.vmem [shape: f32[72,1], index: 2, kind: input, shape index: {}]   ;;  %s1652_s3 = inlined_call_operand.<no memory space> [shape: f32[1], index: 3, kind: input, shape index: {}]   ;;  %s1653_s4 = inlined_call_operand.hbm [shape: f32[2,32,256], index: 4, kind: output, shape index: {}]  }
   0x1   :  { %9 = sst [smem:[#allocation3]] %s1652_s3 }
   0x2   :  { %10 = vsyncpa [#allocation5], 0 }
   0x3   :  { %12 = vsyncpa [#allocation5 + $0x1], 0 }
   0x4   :  { %13 = vsyncpa [#allocation6], 0 }
   0x5   :  { %15 = vsyncpa [#allocation6 + $0x1], 0  ;;  %s1247_s17 = smov 0   ;;  %s1249_s18 = smov 0  }
   0x6   :  { %s1251_s19 = smov 0   ;;  %s1253_s20 = smov 0  }
   0x7 LB: > { %s1268_s3 = sadd.s32 4294967295, %s1208_s20   ;;  %s904_s21 = sadd.s32 4294967294, %s1208_s20   ;;  %s1208_s20 = sphi %s1253_s20, %s1670_s20   ;;  %s1204_s19 = sphi %s1251_s19, %s1669_s19   ;;  %s1200_s18 = sphi %s1249_s18, %s1668_s18   ;;  %s1196_s17 = sphi %s1247_s17, %s1667_s17  }
   0x8   : > { %s1272_s22 = sadd.s32 1, %s1208_s20   ;;  %s28_s23 = sadd.s32 1, %s1204_s19 }
   0x9   : > { %s25_s24 = ssub.s32 %s1208_s20, %s1272_s22  ;;  %p35_p0 = scmp.ne.s32.totalorder %s1204_s19, %s1200_s18 }
   0xa   : > { %p26_p1 = scmp.eq.s32.totalorder %s25_s24, 0  ;;  %p36_p2 = scmp.eq.s32.totalorder %s1208_s20, 0 }
   0xb   : > { %p41_p3 = scmp.ne.s32.totalorder %s1200_s18, %s1196_s17  ;;  %p42_p4 = scmp.eq.s32.totalorder %s1268_s3, 0 }
   0xc   : > { %s1284_s25 = scalar_select %p26_p1, %s1204_s19, %s28_s23  }
   0xd   : > { %p1286_p5 = por %p36_p2, %p35_p0  ;;  %p1290_p6 = por %p42_p4, %p41_p3 }
   0xe   : > { %p128_p7 = scmp.eq.s32.totalorder %s1268_s3, 1  ;;  %p134_p8 = scmp.eq.s32.totalorder %s904_s21, 1 }
   0xf   : > { %p991_p10 = scmp.lt.s32.totalorder %s1208_s20, 2  ;;  %s163_s30 = sand.u32 1, %s1204_s19  }
  0x10   : > { %p1297_p11 = por %p128_p7, %p35_p0  ;;  %p1301_p12 = por %p134_p8, %p41_p3 }
  0x11   : > { %s968_s5 = sshll.u32 %s1208_s20, 6  ;;  %s907_s6 = sshll.u32 %s163_s30, 6 }
  0x12   : > { %s172_s9 = scalar_lea.hbm %s1649_s0, %s968_s5  ;;  %s167_s11 = scalar_lea.vmem [#allocation4], %s907_s6 }
  0x13   : > { %s173_s10 = sshll.u32 %s172_s9, 4  ;;  %s175_s12 = sshll.u32 %s167_s11, 4  ;;  %s174_s10 = int_to_ptr.hbm [resolvable:$true] %s173_s10  ;;  %s176_s12 = int_to_ptr.vmem [resolvable:$true] %s175_s12 }
  0x14   : > { %p1312_p13 = pnand %p991_p10, %p1286_p5  ;;  %p910_p0 = scmp.ge.s32.totalorder %s1208_s20, 1 }
  0x15   : > { %p183_p1 = scmp.lt.s32.totalorder %s1208_s20, 3  ;;  %s164_s14 = scalar_lea.sflag [#allocation5], %s163_s30 }
  0x16   : > { %s1108_s15 = sshra.s32 %s174_s10, 4  ;;  %p1112_p3 = pneg %p1312_p13  ;;  %s1109_s15 = int_to_ptr.hbm [resolvable:$true] %s1108_s15 }
  0x17   : > { %s1110_s16 = scalar_lea.hbm %s1109_s15, 64  ;;  %s1115_s24 = scalar_lea.hbm %s1649_s0, 128 }
  0x18   : > { %p1111_p2 = scmp.ne.s32.totalorder %s1109_s15, %s1110_s16  ;;  %p1116_p5 = scmp.lt.s32.totalorder %s1109_s15, %s1649_s0 }
  0x19   : > { %p1117_p8 = scmp.lt.s32.totalorder %s1115_s24, %s1110_s16 }
  0x1a   : > { %p1113_p4 = pnand %p1112_p3, %p1111_p2 }
  0x1b   : > { %p1118_p10 = por %p1117_p8, %p1116_p5 }
  0x1c   : > { %p1114_p7 = pneg %p1113_p4 }
  0x1e   : > { %p1119_p9 = pnand %p1118_p10, %p1114_p7 }
  0x20   : > { %1122 = shalt.err (!%p1119_p9)
}
  0x21   : > { %s1214_s30 = smov 256   ;;  %s1215_s6 = smov 16  }
  0x22   : > { %986 = dma.hbm_to_vmem [thread:$0]  (!%p1312_p13), %s174_s10, 1024, %s176_s12, %s164_s14, %s1214_s30, %s1214_s30, %s1215_s6  }
  0x23   : > { %p184_p2 = pnand %p910_p0, %p183_p1 }
  0x24   : > { %s1333_s7 = sand.u32 (!%p184_p2), 1, %s1200_s18  }
  0x25   : > { %187 = sbr.rel (%p184_p2) target bundleno = 1031 (0x407), region = 36  ;;  %s911_s8 = sshll.u32 (!%p184_p2), %s1333_s7, 6 }
  0x26   : > { %s190_s9 = scalar_lea.sflag (!%p184_p2), [#allocation5], %s1333_s7  ;;  %s1339_s11 = scalar_lea.vmem (!%p184_p2), [#allocation4], %s911_s8 }
  0x2a   : > { %1187 = dma.done.wait (%p1290_p6), %s190_s9, 1024  }
  0x2b   : > { %1189 = vsyncadd (%p1290_p6), %s190_s9, 4294966272  ;;  %s1345_s10 = sld [smem:[#allocation3]]  ;;  %v1216_v0 = vmov 0   ;;  %v224_v1 = vld [vmem:[%s1339_s11 + $0x20] sm:$0xff]  ;;  %v226_v2 = vld [vmem:[%s1339_s11 + $0x30] sm:$0xff]  ;;  %vm319_vm0 = vcmask 261120  }
  0x2c   : > { %1039 = vset.pattern.permute.xlu0 %v1216_v0  ;;  %1040 = vset.pattern.permute.xlu1 %v1216_v0  ;;  %v225_v3 = vld [vmem:[%s1339_s11 + $0x28] sm:$0xff]  ;;  %v249_v4 = vpack.c.bf16 %v226_v2, %v224_v1  ;;  %v227_v5 = vld [vmem:[%s1339_s11 + $0x38] sm:$0xff]  ;;  %v220_v6 = vld [vmem:[%s1339_s11] sm:$0xff]  ;;  %s1453_s27 = scalar_lea.vmem [#allocation7], %s911_s8  ;;  %s1455_s12 = smov 0  }
  0x2d   : > { %1041 = vset.pattern.permute.xlu2 %v1216_v0  ;;  %v222_v7 = vld [vmem:[%s1339_s11 + $0x10] sm:$0xff]  ;;  %v250_v8 = vpack.c.bf16 %v227_v5, %v225_v3  ;;  %v221_v9 = vld [vmem:[%s1339_s11 + $0x8] sm:$0xff]  ;;  %v223_v10 = vld [vmem:[%s1339_s11 + $0x18] sm:$0xff] }
  0x2e   : > { %341 = vmatpush.bf16.msra.mxu0 %v249_v4  ;;  %975 = vmatpush.bf16.msra.mxu2 %v249_v4  ;;  %v247_v11 = vpack.c.bf16 %v222_v7, %v220_v6  ;;  %v237_v12 = vld [vmem:[%s1651_s2] sm:$0xff]  ;;  %v239_v13 = vld [vmem:[%s1651_s2 + $0x10] sm:$0xff]  ;;  %v248_v14 = vpack.c.bf16 %v223_v10, %v221_v9  ;;  %v972_v16 = vld [vmem:[%s1650_s1 + $0x18] sm:$0xff] }
  0x2f   : > { %374 = vmatpush.bf16.msra.mxu1 %v250_v8  ;;  %977 = vmatpush.bf16.msra.mxu3 %v250_v8  ;;  %v969_v15 = vld [vmem:[%s1650_s1] sm:$0xff]  ;;  %v238_v17 = vld [vmem:[%s1651_s2 + $0x8] sm:$0xff]  ;;  %v240_v18 = vld [vmem:[%s1651_s2 + $0x18] sm:$0xff] }
  0x30   : > { %253 = vperm.xlu0 %1039, %v237_v12   ;;  %263 = vperm.xlu1 %1040, %v239_v13   ;;  %v241_v19 = vld [vmem:[%s1651_s2 + $0x20] sm:$0xff]  ;;  %v242_v21 = vld [vmem:[%s1651_s2 + $0x28] sm:$0xff]  ;;  %v244_v23 = vld [vmem:[%s1651_s2 + $0x38] sm:$0xff] }
  0x31   : > { %273 = vperm.xlu2 %1041, %v241_v19   ;;  %v236_v20 = vld [vmem:[%s1650_s1 + $0x20] sm:$0xf]  ;;  %v243_v24 = vld [vmem:[%s1651_s2 + $0x30] sm:$0xff]  ;;  %v970_v25 = vld [vmem:[%s1650_s1 + $0x8] sm:$0xff] }
  0x32   : > { %342 = vmatpush.bf16.msra.mxu0 %v247_v11  ;;  %976 = vmatpush.bf16.msra.mxu2 %v247_v11  ;;  %v313_v22 = vunpack.c.l.b16 %v236_v20  ;;  %v245_v27 = vld [vmem:[%s1651_s2 + $0x40] sm:$0xff]  ;;  %v971_v28 = vld [vmem:[%s1650_s1 + $0x10] sm:$0xff] }
  0x33   : > { %375 = vmatpush.bf16.msra.mxu1 %v248_v14  ;;  %978 = vmatpush.bf16.msra.mxu3 %v248_v14 }
  0x34   : > { %v318_v26 = vpack.c.b16 %v313_v22, %v313_v22 }
  0x35   : > { %929 = vmatmul.msk.bf16.vlgmr.msra.gmra.mxu0 %vm319_vm0, %v969_v15  ;;  %932 = vmatmul.msk.bf16.vlgmr.msra.gmra.mxu2 %vm319_vm0, %v972_v16 }
  0x36   : > { %934 = vmatmul.msk.bf16.vlgmr.msra.gmra.mxu1 %vm319_vm0, %v969_v15  ;;  %937 = vmatmul.msk.bf16.vlgmr.msra.gmra.mxu3 %vm319_vm0, %v972_v16 }
  0x38   : > { %258 = vperm.xlu0 %1039, %v238_v17   ;;  %268 = vperm.xlu1 %1040, %v240_v18  }
  0x39   : > { %278 = vperm.xlu2 %1041, %v242_v21  }
  0x40   : > { %288 = vperm.xlu1 %1040, %v244_v23   ;;  %283 = vperm.xlu0 %1039, %v243_v24  }
  0x41   : > { %293 = vperm.xlu2 %1041, %v245_v27  }
  0x45   : > { %930 = vmatmul.msk.bf16.gmra.mxu0 %vm319_vm0, %v970_v25  ;;  %933 = vmatmul.msk.bf16.gmra.mxu2 %vm319_vm0, %v318_v26 }
  0x46   : > { %935 = vmatmul.msk.bf16.gmra.mxu1 %vm319_vm0, %v970_v25  ;;  %938 = vmatmul.msk.bf16.gmra.mxu3 %vm319_vm0, %v318_v26 }
  0x55   : > { %931 = vmatmul.msk.bf16.gmra.mxu0 %vm319_vm0, %v971_v28 }
  0x56   : > { %936 = vmatmul.msk.bf16.gmra.mxu1 %vm319_vm0, %v971_v28 }
  0x8b   : > { %v274_v32 = vpop.permute.xlu2 %273 }
  0x93   : > { %v279_v45 = vpop.permute.xlu2 %278 }
  0x9b   : > { %v294_v59 = vpop.permute.xlu2 %293 }
  0xa2   : > { %v254_v29 = vpop.permute.xlu0 %253  ;;  %v264_v30 = vpop.permute.xlu1 %263 }
  0xaa   : > { %v259_v36 = vpop.permute.xlu0 %258  ;;  %v269_v37 = vpop.permute.xlu1 %268 }
  0xb2   : > { %v344_v31 = vpop.f32.mrf.mxu0  ;;  %v284_v46 = vpop.permute.xlu0 %283 }
  0xb3   : > { %v345_v33 = vadd.f32 %v344_v31, %v254_v29  ;;  %v377_v34 = vpop.f32.mrf.mxu1  ;;  %v289_v48 = vpop.permute.xlu1 %288 }
  0xb4   : > { %v378_v35 = vadd.f32 %v377_v34, %v254_v29 }
  0xb6   : > { %v401_v38 = vpack.c.bf16 %v378_v35, %v345_v33 }
  0xb8   : > { %403 = vst [vmem:[#allocation2] sm:$0xff] %v401_v38  ;;  %v359_v39 = vpop.f32.mrf.mxu2 }
  0xb9   : > { %v392_v40 = vpop.f32.mrf.mxu3  ;;  %v1407_v49 = vadd.f32 %v359_v39, %v284_v46 }
  0xba   : > { %v346_v41 = vpop.f32.mrf.mxu0  ;;  %v1409_v51 = vadd.f32 %v392_v40, %v284_v46 }
  0xbb   : > { %v347_v42 = vadd.f32 %v346_v41, %v259_v36  ;;  %v379_v43 = vpop.f32.mrf.mxu1 }
  0xbc   : > { %v380_v44 = vadd.f32 %v379_v43, %v259_v36 }
  0xbe   : > { %v402_v47 = vpack.c.bf16 %v380_v44, %v347_v42 }
  0xc0   : > { %404 = vst [vmem:[#allocation2 + $0x8] sm:$0xff] %v402_v47  ;;  %v361_v50 = vpop.f32.mrf.mxu2 }
  0xc1   : > { %v394_v52 = vpop.f32.mrf.mxu3  ;;  %v1411_v53 = vadd.f32 %v361_v50, %v289_v48 }
  0xc2   : > { %v349_v54 = vpop.f32.mrf.mxu0  ;;  %v1413_v55 = vadd.f32 %v394_v52, %v289_v48 }
  0xc3   : > { %v382_v56 = vpop.f32.mrf.mxu1  ;;  %v1423_v1 = vadd.f32 %v349_v54, %v264_v30 }
  0xc4   : > { %v1429_v5 = vadd.f32 %v382_v56, %v264_v30 }
  0xc8   : > { %v364_v60 = vpop.f32.mrf.mxu2 }
  0xc9   : > { %v1419_v61 = vadd.f32 %v364_v60, %v294_v59  ;;  %v397_v62 = vpop.f32.mrf.mxu3 }
  0xca   : > { %v351_v63 = vpop.f32.mrf.mxu0  ;;  %v1421_v0 = vadd.f32 %v397_v62, %v294_v59 }
  0xcb   : > { %v1425_v2 = vadd.f32 %v351_v63, %v269_v37  ;;  %v384_v4 = vpop.f32.mrf.mxu1 }
  0xcc   : > { %v1431_v6 = vadd.f32 %v384_v4, %v269_v37 }
  0xd0   : > { %v366_v10 = vpop.f32.mrf.mxu2 }
  0xd1   : > { %v399_v11 = vpop.f32.mrf.mxu3 }
  0xd2   : > { %v354_v12 = vpop.f32.mrf.mxu0 }
  0xd3   : > { %v387_v13 = vpop.f32.mrf.mxu1  ;;  %v1439_v15 = vadd.f32 %v354_v12, %v274_v32 }
  0xd4   : > { %v1443_v18 = vadd.f32 %v387_v13, %v274_v32 }
  0xda   : > { %v356_v14 = vpop.f32.mrf.mxu0 }
  0xdb   : > { %v1441_v16 = vadd.f32 %v356_v14, %v279_v45  ;;  %v389_v17 = vpop.f32.mrf.mxu1 }
  0xdc   : > { %v1445_v19 = vadd.f32 %v389_v17, %v279_v45 }
  0xdd   : > { %v407_v20 = vpack.c.bf16 %v1441_v16, %v1439_v15 }
  0xde LB: >> { %v1659_v8 = vpack.c.bf16 %v1425_v2, %v1423_v1  ;;  %v1660_v9 = vpack.c.bf16 %v1431_v6, %v1429_v5  ;;  %s939_s13 = sshll.u32 %s1212_s12, 7  ;;  %vm448_vm1 = vcmask 130048   ;;  %s418_s12 = sadd.s32 1, %s1212_s12   ;;  %s1212_s12 = sphi %s1455_s12, %s418_s12  }
  0xdf   : >> { %s1467_s14 = sshra.s32 %s939_s13, 7  ;;  %p415_p6 = scmp.ge.s32.totalorder %s418_s12, 2  }
  0xe0   : >> { %480 = vmatpush.bf16.msra.mxu0 %v1659_v8  ;;  %529 = vmatpush.bf16.msra.mxu1 %v1660_v9  ;;  %s940_s8 = sshll.u32 %s1467_s14, 2  ;;  %s961_s16 = sshll.u32 %s1467_s14, 3 }
  0xe1   : >> { %s423_s15 = scalar_lea.vmem [#allocation2], %s940_s8  ;;  %s784_s21 = scalar_lea.vmem %s1339_s11, %s961_s16 [#allocation4] }
  0xe2   : >> { %v943_v22 = vld [vmem:[%s423_s15] sm:$0xf]  ;;  %v973_v23 = vld [vmem:[%s423_s15 + $0x4] sm:$0xf0]  ;;  %s799_s23 = scalar_lea.vmem %s1453_s27, %s961_s16 [#allocation7]  ;;  %s974_s24 = sshll.u32 (%p415_p6), %s1268_s3, 6 }
  0xe3   : >> { %v944_v24 = vor.u32 %v973_v23, %v943_v22  ;;  %s816_s30 = scalar_lea.hbm (%p415_p6), %s1653_s4, %s974_s24  ;;  %s817_s6 = sshll.u32 (%p415_p6), %s1453_s27, 4  ;;  %s818_s6 = int_to_ptr.vmem [resolvable:$true] %s817_s6 }
  0xe4   : > { %s819_s9 = sshll.u32 (%p415_p6), %s816_s30, 4  ;;  %s805_s13 = scalar_lea.sflag (%p415_p6), [#allocation6], %s1333_s7  ;;  %s820_s9 = int_to_ptr.hbm [resolvable:$true] %s819_s9 }
  0xe5   : >> { %432 = vxpose.xlu0.c.b16.start.end [1/1] (short) %v944_v24, 128  ;;  %s1152_s14 = sshra.s32 (%p415_p6), %s820_s9, 4  ;;  %s1158_s3 = scalar_lea.hbm (%p415_p6), %s1653_s4, 128  ;;  %s1153_s14 = int_to_ptr.hbm [resolvable:$true] %s1152_s14 }
  0xe6   : > { %s1154_s8 = scalar_lea.hbm (%p415_p6), %s1153_s14, 64  ;;  %p1159_p1 = scmp.lt.s32.totalorder (%p415_p6), %s1153_s14, %s1653_s4 }
  0xe7   : > { %p1155_p9 = scmp.ne.s32.totalorder (%p415_p6), %s1153_s14, %s1154_s8  ;;  %p1160_p3 = scmp.lt.s32.totalorder (%p415_p6), %s1158_s3, %s1154_s8 }
  0xe9   : > { %p1156_p13 = pnand (%p415_p6), %p1155_p9, %p1297_p11  ;;  %p1161_p4 = por (%p415_p6), %p1160_p3, %p1159_p1 }
  0xeb   : > { %p1157_p0 = pneg (%p415_p6), %p1156_p13 }
  0xed   : > { %p1162_p7 = pnand (%p415_p6), %p1161_p4, %p1157_p0 }
 0x191   : >> { %v440_v25 = vpop.trf.xlu0 }
 0x192   : >> { %945 = vmatmul.msk.bf16.vlgmr.msra.gmra.mxu0 %vm448_vm1, %v440_v25  ;;  %953 = vmatmul.msk.bf16.vlgmr.msra.gmra.mxu1 %vm448_vm1, %v440_v25 }
 0x1a1   : >> { %v441_v26 = vpop.trf.xlu0 }
 0x1a2   : >> { %946 = vmatmul.msk.bf16.gmra.mxu0 %vm448_vm1, %v441_v26  ;;  %954 = vmatmul.msk.bf16.gmra.mxu1 %vm448_vm1, %v441_v26 }
 0x1b1   : >> { %v442_v27 = vpop.trf.xlu0 }
 0x1b2   : >> { %947 = vmatmul.msk.bf16.gmra.mxu0 %vm448_vm1, %v442_v27  ;;  %955 = vmatmul.msk.bf16.gmra.mxu1 %vm448_vm1, %v442_v27 }
 0x1c1   : >> { %v443_v28 = vpop.trf.xlu0 }
 0x1c2   : >> { %948 = vmatmul.msk.bf16.gmra.mxu0 %vm448_vm1, %v443_v28  ;;  %956 = vmatmul.msk.bf16.gmra.mxu1 %vm448_vm1, %v443_v28 }
 0x1d1   : >> { %v444_v29 = vpop.trf.xlu0 }
 0x1d2   : >> { %949 = vmatmul.msk.bf16.gmra.mxu0 %vm448_vm1, %v444_v29  ;;  %957 = vmatmul.msk.bf16.gmra.mxu1 %vm448_vm1, %v444_v29 }
 0x1e1   : >> { %v445_v30 = vpop.trf.xlu0 }
 0x1e2   : >> { %950 = vmatmul.msk.bf16.gmra.mxu0 %vm448_vm1, %v445_v30  ;;  %958 = vmatmul.msk.bf16.gmra.mxu1 %vm448_vm1, %v445_v30 }
 0x1f1   : >> { %v446_v31 = vpop.trf.xlu0 }
 0x1f2   : >> { %951 = vmatmul.msk.bf16.gmra.mxu0 %vm448_vm1, %v446_v31  ;;  %959 = vmatmul.msk.bf16.gmra.mxu1 %vm448_vm1, %v446_v31 }
 0x201   : >> { %v447_v32 = vpop.trf.xlu0 }
 0x202   : >> { %952 = vmatmul.msk.bf16.gmra.mxu0 %vm448_vm1, %v447_v32  ;;  %960 = vmatmul.msk.bf16.gmra.mxu1 %vm448_vm1, %v447_v32 }
 0x20f   : >> { %v1486_v33 = vpop.f32.mrf.mxu0  ;;  %v1488_v34 = vpop.f32.mrf.mxu1 }
 0x217   : >> { %v1490_v35 = vpop.f32.mrf.mxu0  ;;  %v1492_v36 = vpop.f32.mrf.mxu1 }
 0x21f   : >> { %v1494_v37 = vpop.f32.mrf.mxu0  ;;  %v1496_v38 = vpop.f32.mrf.mxu1 }
 0x220   : >> { %v577_v32 = vmax.f32 %v1494_v37, %v1496_v38 }
 0x227   : >> { %v1498_v39 = vpop.f32.mrf.mxu0  ;;  %v1500_v40 = vpop.f32.mrf.mxu1 }
 0x22f   : >> { %v1502_v41 = vpop.f32.mrf.mxu0  ;;  %v1504_v42 = vpop.f32.mrf.mxu1 }
 0x230   : >> { %v583_v30 = vmax.f32 %v1502_v41, %v1504_v42 }
 0x237   : >> { %v1506_v43 = vpop.f32.mrf.mxu0  ;;  %v1508_v44 = vpop.f32.mrf.mxu1 }
 0x23f   : >> { %v1510_v45 = vpop.f32.mrf.mxu0  ;;  %v1512_v46 = vpop.f32.mrf.mxu1 }
 0x240   : >> { %v589_v28 = vmax.f32 %v1510_v45, %v1512_v46 }
 0x247   : >> { %v1514_v47 = vpop.f32.mrf.mxu0  ;;  %v1516_v48 = vpop.f32.mrf.mxu1 }
 0x24f   : >> { %v1518_v50 = vpop.f32.mrf.mxu0  ;;  %v1520_v52 = vpop.f32.mrf.mxu1 }
 0x250   : >> { %v595_v26 = vmax.f32 %v1518_v50, %v1520_v52 }
 0x257   : >> { %v1522_v54 = vpop.f32.mrf.mxu0  ;;  %v1524_v56 = vpop.f32.mrf.mxu1 }
 0x25f   : >> { %v1526_v59 = vpop.f32.mrf.mxu0  ;;  %v1528_v60 = vpop.f32.mrf.mxu1 }
 0x260   : >> { %v601_v22 = vmax.f32 %v1526_v59, %v1528_v60 }
 0x267   : >> { %v1530_v62 = vpop.f32.mrf.mxu0  ;;  %v1532_v63 = vpop.f32.mrf.mxu1 }
 0x268   : >> { %v604_v31 = vmax.f32 %v1530_v62, %v1532_v63 }
 0x26f   : >> { %v1534_v4 = vpop.f32.mrf.mxu0  ;;  %v1536_v10 = vpop.f32.mrf.mxu1 }
 0x270   : >> { %v607_v29 = vmax.f32 %v1534_v4, %v1536_v10 }
 0x277   : >> { %v514_v11 = vpop.f32.mrf.mxu0  ;;  %v563_v12 = vpop.f32.mrf.mxu1 }
 0x278   : >> { %v610_v13 = vmax.f32 %v514_v11, %v563_v12 }
 0x27a   : >> { %611 = vmax.xlane.f32.xlu2 %v610_v13  ;;  %v598_v13 = vmax.f32 %v1522_v54, %v1524_v56 }
 0x27f   : >> { %v517_v14 = vpop.f32.mrf.mxu0  ;;  %v566_v17 = vpop.f32.mrf.mxu1 }
 0x280   : >> { %v613_v23 = vmax.f32 %v517_v14, %v566_v17 }
 0x282   : >> { %602 = vmax.xlane.f32.xlu2 %v601_v22  ;;  %614 = vmax.xlane.f32.xlu0 %v613_v23  ;;  %v571_v22 = vmax.f32 %v1486_v33, %v1488_v34  ;;  %v592_v23 = vmax.f32 %v1514_v47, %v1516_v48 }
 0x287   : >> { %v519_v24 = vpop.f32.mrf.mxu0  ;;  %v568_v25 = vpop.f32.mrf.mxu1 }
 0x288   : >> { %v616_v27 = vmax.f32 %v519_v24, %v568_v25 }
 0x28a   : >> { %596 = vmax.xlane.f32.xlu2 %v595_v26  ;;  %617 = vmax.xlane.f32.xlu1 %v616_v27  ;;  %v586_v26 = vmax.f32 %v1506_v43, %v1508_v44  ;;  %v580_v27 = vmax.f32 %v1498_v39, %v1500_v40 }
 0x292   : >> { %590 = vmax.xlane.f32.xlu2 %v589_v28  ;;  %608 = vmax.xlane.f32.xlu1 %v607_v29  ;;  %v574_v28 = vmax.f32 %v1490_v35, %v1492_v36 }
 0x29a   : >> { %584 = vmax.xlane.f32.xlu2 %v583_v30  ;;  %605 = vmax.xlane.f32.xlu1 %v604_v31 }
 0x2a2   : >> { %578 = vmax.xlane.f32.xlu2 %v577_v32  ;;  %599 = vmax.xlane.f32.xlu1 %v598_v13 }
 0x2aa   : >> { %572 = vmax.xlane.f32.xlu2 %v571_v22  ;;  %593 = vmax.xlane.f32.xlu1 %v592_v23 }
 0x2b2   : >> { %587 = vmax.xlane.f32.xlu1 %v586_v26 }
 0x2ba   : >> { %581 = vmax.xlane.f32.xlu1 %v580_v27 }
 0x2c2   : >> { %575 = vmax.xlane.f32.xlu1 %v574_v28 }
 0x2ed   : >> { %v612_v29 = vpop.xlane.xlu2 %611 }
 0x2ee   : >> { %v645_v58 = vsub.f32 %v514_v11, %v612_v29  ;;  %v646_v57 = vsub.f32 %v563_v12, %v612_v29 }
 0x2f0   : >> { %v703_v21 = vmul.f32 1.442695, %v645_v58 }
 0x2f5   : >> { %v615_v30 = vpop.xlane.xlu0 %614  ;;  %v603_v32 = vpop.xlane.xlu2 %602 }
 0x2f6   : >> { %v647_v31 = vsub.f32 %v517_v14, %v615_v30  ;;  %v648_v13 = vsub.f32 %v566_v17, %v615_v30  ;;  %v705_v30 = vmul.f32 1.442695, %v646_v57 }
 0x2f8   : >> { %v707_v22 = vmul.f32 1.442695, %v647_v31  ;;  %v709_v7 = vmul.f32 1.442695, %v648_v13 }
 0x2fa   : >> { %1042 = vpow2.f32 %v707_v22 }
 0x2fb   : >> { %1044 = vpow2.f32 %v709_v7 }
 0x2fd   : >> { %v618_v8 = vpop.xlane.xlu1 %617  ;;  %v597_v27 = vpop.xlane.xlu2 %596 }
 0x2fe   : >> { %v649_v23 = vsub.f32 %v519_v24, %v618_v8  ;;  %v650_v9 = vsub.f32 %v568_v25, %v618_v8 }
 0x300   : >> { %v711_v3 = vmul.f32 1.442695, %v649_v23  ;;  %v713_v26 = vmul.f32 1.442695, %v650_v9  ;;  %v1043_v31 = vpop.eup %1042  ;;  %v639_v9 = vsub.f32 %v1526_v59, %v603_v32 }
 0x301   : >> { %v1045_v8 = vpop.eup %1044 }
 0x302   : >> { %1046 = vpow2.f32 %v711_v3  ;;  %v640_v3 = vsub.f32 %v1528_v60, %v603_v32  ;;  %v635_v60 = vsub.f32 %v1518_v50, %v597_v27 }
 0x303   : >> { %1048 = vpow2.f32 %v713_v26 }
 0x304   : >> { %1050 = vpow2.f32 %v703_v21  ;;  %v693_v29 = vmul.f32 1.442695, %v640_v3 }
 0x305   : >> { %v609_v28 = vpop.xlane.xlu1 %608  ;;  %1052 = vpow2.f32 %v705_v30  ;;  %v591_v21 = vpop.xlane.xlu2 %590 }
 0x306   : >> { %v643_v14 = vsub.f32 %v1534_v4, %v609_v28  ;;  %v644_v17 = vsub.f32 %v1536_v10, %v609_v28  ;;  %v691_v10 = vmul.f32 1.442695, %v639_v9 }
 0x308   : >> { %v699_v24 = vmul.f32 1.442695, %v643_v14  ;;  %v701_v25 = vmul.f32 1.442695, %v644_v17  ;;  %v1047_v13 = vpop.eup %1046  ;;  %v636_v14 = vsub.f32 %v1520_v52, %v597_v27  ;;  %v631_v52 = vsub.f32 %v1510_v45, %v591_v21 }
 0x309   : >> { %v1049_v11 = vpop.eup %1048  ;;  %v729_v7 = vpack.c.bf16 %v1047_v13, %v1043_v31 }
 0x30a   : >> { %1054 = vpow2.f32 %v699_v24  ;;  %v730_v58 = vpack.c.bf16 %v1049_v11, %v1045_v8  ;;  %v1051_v22 = vpop.eup %1050  ;;  %v685_v8 = vmul.f32 1.442695, %v636_v14 }
 0x30b   : >> { %1056 = vpow2.f32 %v701_v25  ;;  %731 = vmatpush.bf16.xpose.msra.mxu2 %v729_v7  ;;  %v1053_v23 = vpop.eup %1052  ;;  %v632_v7 = vsub.f32 %v1512_v46, %v591_v21 }
 0x30c   : >> { %754 = vmatpush.bf16.xpose.msra.mxu3 %v730_v58  ;;  %1058 = vpow2.f32 %v691_v10 }
 0x30d   : >> { %v606_v4 = vpop.xlane.xlu1 %605  ;;  %1060 = vpow2.f32 %v693_v29  ;;  %v585_v9 = vpop.xlane.xlu2 %584 }
 0x30e   : >> { %v641_v57 = vsub.f32 %v1530_v62, %v606_v4  ;;  %v642_v12 = vsub.f32 %v1532_v63, %v606_v4  ;;  %v683_v63 = vmul.f32 1.442695, %v635_v60  ;;  %v627_v45 = vsub.f32 %v1502_v41, %v585_v9 }
 0x30f   : >> { %v628_v46 = vsub.f32 %v1504_v42, %v585_v9 }
 0x310   : >> { %v695_v59 = vmul.f32 1.442695, %v641_v57  ;;  %v697_v26 = vmul.f32 1.442695, %v642_v12  ;;  %v1055_v28 = vpop.eup %1054  ;;  %v677_v12 = vmul.f32 1.442695, %v632_v7 }
 0x311   : >> { %v1057_v32 = vpop.eup %1056  ;;  %v727_v17 = vpack.c.bf16 %v1051_v22, %v1055_v28  ;;  %v669_v14 = vmul.f32 1.442695, %v628_v46 }
 0x312   : >> { %1062 = vpow2.f32 %v695_v59  ;;  %v728_v30 = vpack.c.bf16 %v1053_v23, %v1057_v32  ;;  %v1059_v25 = vpop.eup %1058  ;;  %v667_v32 = vmul.f32 1.442695, %v627_v45 }
 0x313   : >> { %1064 = vpow2.f32 %v697_v26  ;;  %732 = vmatpush.bf16.xpose.msra.mxu2 %v727_v17  ;;  %v1061_v50 = vpop.eup %1060 }
 0x314   : >> { %755 = vmatpush.bf16.xpose.msra.mxu3 %v728_v30  ;;  %1066 = vpow2.f32 %v683_v63 }
 0x315   : >> { %v600_v62 = vpop.xlane.xlu1 %599  ;;  %1068 = vpow2.f32 %v685_v8  ;;  %v579_v28 = vpop.xlane.xlu2 %578 }
 0x316   : >> { %v637_v31 = vsub.f32 %v1522_v54, %v600_v62  ;;  %v638_v24 = vsub.f32 %v1524_v56, %v600_v62  ;;  %v675_v56 = vmul.f32 1.442695, %v631_v52  ;;  %v623_v30 = vsub.f32 %v1494_v37, %v579_v28 }
 0x318   : >> { %v687_v13 = vmul.f32 1.442695, %v637_v31  ;;  %v689_v11 = vmul.f32 1.442695, %v638_v24  ;;  %v1063_v3 = vpop.eup %1062  ;;  %v624_v24 = vsub.f32 %v1496_v38, %v579_v28 }
 0x319   : >> { %v1065_v27 = vpop.eup %1064  ;;  %v725_v58 = vpack.c.bf16 %v1063_v3, %v1059_v25 }
 0x31a   : >> { %1070 = vpow2.f32 %v687_v13  ;;  %v726_v4 = vpack.c.bf16 %v1065_v27, %v1061_v50  ;;  %v1067_v29 = vpop.eup %1066  ;;  %v659_v50 = vmul.f32 1.442695, %v623_v30 }
 0x31b   : >> { %1072 = vpow2.f32 %v689_v11  ;;  %733 = vmatpush.bf16.xpose.msra.mxu2 %v725_v58  ;;  %v1069_v59 = vpop.eup %1068 }
 0x31c   : >> { %756 = vmatpush.bf16.xpose.msra.mxu3 %v726_v4  ;;  %1074 = vpow2.f32 %v675_v56 }
 0x31d   : >> { %v594_v54 = vpop.xlane.xlu1 %593  ;;  %1076 = vpow2.f32 %v677_v12  ;;  %v573_v11 = vpop.xlane.xlu2 %572 }
 0x31e   : >> { %v633_v10 = vsub.f32 %v1514_v47, %v594_v54  ;;  %v634_v57 = vsub.f32 %v1516_v48, %v594_v54  ;;  %v619_v38 = vsub.f32 %v1486_v33, %v573_v11  ;;  %v620_v56 = vsub.f32 %v1488_v34, %v573_v11 }
 0x320   : >> { %v679_v22 = vmul.f32 1.442695, %v633_v10  ;;  %v681_v21 = vmul.f32 1.442695, %v634_v57  ;;  %v1071_v23 = vpop.eup %1070  ;;  %v651_v12 = vmul.f32 1.442695, %v619_v38 }
 0x321   : >> { %v1073_v26 = vpop.eup %1072  ;;  %v723_v60 = vpack.c.bf16 %v1071_v23, %v1067_v29  ;;  %v653_v29 = vmul.f32 1.442695, %v620_v56 }
 0x322   : >> { %1078 = vpow2.f32 %v679_v22  ;;  %v724_v47 = vpack.c.bf16 %v1073_v26, %v1069_v59  ;;  %v1075_v42 = vpop.eup %1074 }
 0x323   : >> { %1080 = vpow2.f32 %v681_v21  ;;  %734 = vmatpush.bf16.xpose.msra.mxu2 %v723_v60  ;;  %v1077_v31 = vpop.eup %1076 }
 0x324   : >> { %757 = vmatpush.bf16.xpose.msra.mxu3 %v724_v47  ;;  %1082 = vpow2.f32 %v667_v32 }
 0x325   : >> { %v588_v48 = vpop.xlane.xlu1 %587  ;;  %1084 = vpow2.f32 %v669_v14 }
 0x326   : >> { %v629_v41 = vsub.f32 %v1506_v43, %v588_v48  ;;  %v630_v17 = vsub.f32 %v1508_v44, %v588_v48  ;;  %v661_v43 = vmul.f32 1.442695, %v624_v24  ;;  %v1662_v48 = vpack.c.bf16 %v1411_v53, %v1407_v49 }
 0x328   : >> { %v671_v62 = vmul.f32 1.442695, %v629_v41  ;;  %v673_v63 = vmul.f32 1.442695, %v630_v17  ;;  %v1079_v8 = vpop.eup %1078  ;;  %v1663_v41 = vpack.c.bf16 %v1413_v55, %v1409_v51  ;;  %v1664_v17 = vpack.c.bf16 %v1419_v61, %v1419_v61 }
 0x329   : >> { %v1081_v25 = vpop.eup %1080  ;;  %v721_v13 = vpack.c.bf16 %v1079_v8, %v1075_v42  ;;  %v1665_v42 = vpack.c.bf16 %v1421_v0, %v1421_v0 }
 0x32a   : >> { %1086 = vpow2.f32 %v671_v62  ;;  %v722_v9 = vpack.c.bf16 %v1081_v25, %v1077_v31  ;;  %v1083_v3 = vpop.eup %1082 }
 0x32b   : >> { %1088 = vpow2.f32 %v673_v63  ;;  %735 = vmatpush.bf16.xpose.msra.mxu2 %v721_v13  ;;  %v1085_v27 = vpop.eup %1084 }
 0x32c   : >> { %758 = vmatpush.bf16.xpose.msra.mxu3 %v722_v9  ;;  %1090 = vpow2.f32 %v659_v50 }
 0x32d   : >> { %v582_v44 = vpop.xlane.xlu1 %581  ;;  %1092 = vpow2.f32 %v661_v43 }
 0x32e   : >> { %v625_v37 = vsub.f32 %v1498_v39, %v582_v44  ;;  %v626_v52 = vsub.f32 %v1500_v40, %v582_v44 }
 0x330   : >> { %v1087_v7 = vpop.eup %1086  ;;  %v663_v58 = vmul.f32 1.442695, %v625_v37  ;;  %v665_v4 = vmul.f32 1.442695, %v626_v52 }
 0x331   : >> { %v1089_v54 = vpop.eup %1088  ;;  %v719_v10 = vpack.c.bf16 %v1087_v7, %v1083_v3 }
 0x332   : >> { %1094 = vpow2.f32 %v663_v58  ;;  %v720_v57 = vpack.c.bf16 %v1089_v54, %v1085_v27  ;;  %v1091_v40 = vpop.eup %1090  ;;  %v789_v58 = vstv %s1345_s10 }
 0x333   : >> { %1096 = vpow2.f32 %v665_v4  ;;  %736 = vmatpush.bf16.xpose.msra.mxu2 %v719_v10  ;;  %v1093_v22 = vpop.eup %1092 }
 0x334   : >> { %759 = vmatpush.bf16.xpose.msra.mxu3 %v720_v57  ;;  %1098 = vpow2.f32 %v651_v12  ;;  %v785_v57 = vld [vmem:[%s784_s21] sm:$0xff]  ;;  %v786_v12 = vld [vmem:[%s784_s21 + $0x10] sm:$0xff] }
 0x335   : >> { %v576_v39 = vpop.xlane.xlu1 %575  ;;  %1100 = vpow2.f32 %v653_v29  ;;  %v787_v29 = vld [vmem:[%s784_s21 + $0x20] sm:$0xff] }
 0x336   : >> { %v621_v45 = vsub.f32 %v1490_v35, %v576_v39  ;;  %v622_v33 = vsub.f32 %v1492_v36, %v576_v39  ;;  %v1661_v36 = vpack.c.bf16 %v1445_v19, %v1443_v18  ;;  %v788_v39 = vld [vmem:[%s784_s21 + $0x30] sm:$0xff] }
 0x338   : >> { %v1095_v59 = vpop.eup %1094  ;;  %v655_v46 = vmul.f32 1.442695, %v621_v45  ;;  %v657_v21 = vmul.f32 1.442695, %v622_v33 }
 0x339   : >> { %v1097_v34 = vpop.eup %1096  ;;  %v717_v23 = vpack.c.bf16 %v1095_v59, %v1091_v40 }
 0x33a   : >> { %1102 = vpow2.f32 %v655_v46  ;;  %v718_v26 = vpack.c.bf16 %v1097_v34, %v1093_v22  ;;  %v1099_v28 = vpop.eup %1098 }
 0x33b   : >> { %1104 = vpow2.f32 %v657_v21  ;;  %737 = vmatpush.bf16.xpose.msra.mxu2 %v717_v23  ;;  %v1101_v60 = vpop.eup %1100 }
 0x33c   : >> { %760 = vmatpush.bf16.xpose.msra.mxu3 %v718_v26 }
 0x340   : >> { %v1103_v32 = vpop.eup %1102 }
 0x341   : >> { %v1105_v47 = vpop.eup %1104  ;;  %v715_v35 = vpack.c.bf16 %v1103_v32, %v1099_v28 }
 0x342   : >> { %v716_v14 = vpack.c.bf16 %v1105_v47, %v1101_v60 }
 0x343   : >> { %738 = vmatpush.bf16.xpose.msra.mxu2 %v715_v35 }
 0x344   : >> { %761 = vmatpush.bf16.xpose.msra.mxu3 %v716_v14 }
 0x34a   : >> { %739 = vmatmul.bf16.vlgmr.msra.gmra.mxu2 %v407_v20 }
 0x34b   : >> { %762 = vmatmul.bf16.vlgmr.msra.gmra.mxu3 %v1661_v36 }
 0x35a   : >> { %744 = vmatmul.bf16.gmra.mxu2 %v1662_v48 }
 0x35b   : >> { %767 = vmatmul.bf16.gmra.mxu3 %v1663_v41 }
 0x36a   : >> { %749 = vmatmul.bf16.gmra.mxu2 %v1664_v17 }
 0x36b   : >> { %772 = vmatmul.bf16.gmra.mxu3 %v1665_v42 }
 0x3cd   : >> { %v740_v30 = vpop.f32.mrf.mxu2 }
 0x3ce   : >> { %v763_v62 = vpop.f32.mrf.mxu3 }
 0x3cf   : >> { %v764_v37 = vadd.f32 %v763_v62, %v740_v30 }
 0x3d5   : >> { %v742_v63 = vpop.f32.mrf.mxu2 }
 0x3d6   : >> { %v765_v31 = vpop.f32.mrf.mxu3 }
 0x3d7   : >> { %v766_v52 = vadd.f32 %v765_v31, %v742_v63 }
 0x3dd   : >> { %v745_v24 = vpop.f32.mrf.mxu2 }
 0x3de   : >> { %v768_v8 = vpop.f32.mrf.mxu3 }
 0x3df   : >> { %v769_v27 = vadd.f32 %v768_v8, %v745_v24 }
 0x3e5   : >> { %v747_v25 = vpop.f32.mrf.mxu2 }
 0x3e6   : >> { %v770_v13 = vpop.f32.mrf.mxu3 }
 0x3e7   : >> { %v771_v7 = vadd.f32 %v770_v13, %v747_v25 }
 0x3ed   : >> { %v750_v50 = vpop.f32.mrf.mxu2 }
 0x3ee   : >> { %v773_v9 = vpop.f32.mrf.mxu3 }
 0x3ef   : >> { %v774_v43 = vadd.f32 %v773_v9, %v750_v50 }
 0x3f1   : >> { %1106 = vrcp.f32 %v774_v43 }
 0x3f5   : >> { %v752_v11 = vpop.f32.mrf.mxu2 }
 0x3f6   : >> { %v775_v44 = vpop.f32.mrf.mxu3 }
 0x3f7   : >> { %v1107_v3 = vpop.eup %1106 }
 0x3f8   : >> { %v778_v38 = vperm.slane %v1107_v3, 0 }
 0x3fa   : >> { %v779_v4 = vmul.f32 %v778_v38, %v764_v37  ;;  %v780_v54 = vmul.f32 %v778_v38, %v766_v52  ;;  %v781_v56 = vmul.f32 %v778_v38, %v769_v27  ;;  %v782_v10 = vmul.f32 %v778_v38, %v771_v7 }
 0x3fc   : >> { %v790_v40 = vmul.f32 %v789_v58, %v779_v4  ;;  %v791_v45 = vmul.f32 %v789_v58, %v780_v54  ;;  %v792_v33 = vmul.f32 %v789_v58, %v781_v56  ;;  %v793_v22 = vmul.f32 %v789_v58, %v782_v10 }
 0x3fe   : >> { %v794_v59 = vadd.f32 %v790_v40, %v785_v57  ;;  %v795_v46 = vadd.f32 %v791_v45, %v786_v12  ;;  %v796_v21 = vadd.f32 %v792_v33, %v787_v29  ;;  %v797_v34 = vadd.f32 %v793_v22, %v788_v39 }
 0x3ff   : > { %417 = sbr.rel (!%p415_p6) target bundleno = 222 (0xde), region = 91 }
 0x400   : >> { %800 = vst [vmem:[%s799_s23] sm:$0xff] %v794_v59 }
 0x401   : >> { %801 = vst [vmem:[%s799_s23 + $0x10] sm:$0xff] %v795_v46 }
 0x402   : >> { %802 = vst [vmem:[%s799_s23 + $0x20] sm:$0xff] %v796_v21 }
 0x403   : >> { %803 = vst [vmem:[%s799_s23 + $0x30] sm:$0xff] %v797_v34 }
 0x404   : > { %1165 = shalt.err (!%p1162_p7)
}
 0x405   : > { %s1217_s7 = smov 256   ;;  %s1218_s27 = smov 16  }
 0x406   : > { %981 = dma.vmem_to_hbm [thread:$0]  (%p1297_p11), %s818_s6, 1024, %s820_s9, %s805_s13, %s1217_s7, %s1217_s7, %s1218_s27  }
 0x407 PF: > { %s834_s16 = sand.u32 1, %s1196_s17   ;;  %p1666_p5 = scmp.ge.s32.totalorder %s1208_s20, 2 }
 0x408   : > { %s835_s21 = scalar_lea.sflag [#allocation6], %s834_s16 }
 0x409   : > { %p988_p8 = pnand %p1666_p5, %p1301_p12 }
 0x40b   : > { %p989_p10 = pneg %p988_p8 }
 0x40d   : > { %1191 = dma.done.wait (%p989_p10), %s835_s21, 1024  }
 0x40e   : > { %1193 = vsyncadd (%p989_p10), %s835_s21, 4294966272  ;;  %p18_p2 = scmp.ge.s32.totalorder %s1272_s22, 4   ;;  %s1667_s17 = smov %s1200_s18 }
 0x40f   : > { %s1668_s18 = smov %s1204_s19  ;;  %s1669_s19 = smov %s1284_s25 }
 0x410   : > { %s1670_s20 = smov %s1272_s22  ;;  %20 = sbr.rel (!%p18_p2) target bundleno = 7 (0x7), region = 102 }
 0x415   :  { %841 = vsyncpa [#allocation5], 1 }
 0x416   :  { %843 = vsyncpa [#allocation5 + $0x1], 1 }
 0x417   :  { %844 = vsyncpa [#allocation6], 1 }
 0x418   :  { %846 = vsyncpa [#allocation6 + $0x1], 1 }

</bundles_post_ra>
